<compile_context>
chip_gen: v7x
topology: tpu7x:2x2x1
jax: 0.10.0
libtpu: 0.0.40
codegen_flags: <defaults>
</compile_context>

<pallas_src>
import math

import jax
import jax.numpy as jnp
from jax.experimental import pallas as pl
from jax.experimental.pallas import tpu as pltpu

LOG2 = math.log(2.0)


def _round_up(x, m):
    return ((x + m - 1) // m) * m


def _shifted_softplus(x):
    # softplus(x) - log(2), numerically stable, Mosaic-friendly (no log1p).
    return jnp.maximum(x, 0.0) + jnp.log(1.0 + jnp.exp(-jnp.abs(x))) - LOG2


# ----------------------------------------------------------------------------
# Kernel 1: out_net MLP over the flattened (B*A, n_in) representation.
# ----------------------------------------------------------------------------
def mlp_kernel(rep_ref, w1_ref, b1_ref, w2_ref, b2_ref, out_ref):
    # rep_ref: (TM, n_in_p) bf16   w1: (n_in_p, Hp) bf16   b1: (1, Hp) f32
    # w2: (Hp, n_out_p) f32        b2: (1, n_out_p) f32    out: (TM, n_out_p) f32
    h = jnp.dot(rep_ref[...], w1_ref[...], preferred_element_type=jnp.float32)
    h = _shifted_softplus(h + b1_ref[...])                                   # (TM, Hp)
    q = jnp.dot(h, w2_ref[...], preferred_element_type=jnp.float32) + b2_ref[...]
    out_ref[...] = q                                                         # lane-dense store


def out_net(representation, params):
    """Pyramidal 2-layer MLP: (B, A, n_in) -> contributions (B, A, n_out)."""
    B, A, n_in = representation.shape
    H = params["w1"].shape[1]
    n_out = params["w2"].shape[1]

    n_in_p = _round_up(n_in, 128)
    Hp = _round_up(H, 128)
    n_out_p = _round_up(n_out, 128)        # lane-dense output, slice [:, :n_out] later

    # Weights: zero padding is exact (ssp(0)=0, zero rows/cols of W2 contribute 0).
    w1 = params["w1"].astype(jnp.float32)
    if (n_in_p != n_in) or (Hp != H):
        w1 = jnp.pad(w1, ((0, n_in_p - n_in), (0, Hp - H)))
    w1 = w1.astype(jnp.bfloat16)                                   # bf16 MXU operand
    b1 = params["b1"].astype(jnp.float32)
    if Hp != H:
        b1 = jnp.pad(b1, (0, Hp - H))
    b1 = b1.reshape(1, Hp)
    w2 = params["w2"].astype(jnp.float32)
    if (Hp != H) or (n_out_p != n_out):
        w2 = jnp.pad(w2, ((0, Hp - H), (0, n_out_p - n_out)))
    b2 = params["b2"].astype(jnp.float32)
    if n_out_p != n_out:
        b2 = jnp.pad(b2, (0, n_out_p - n_out))
    b2 = b2.reshape(1, n_out_p)

    # Flattened, bf16 representation.  No host-side zero-pad copy of the big
    # (M, n_in) array: feature axis already 128-wide at the default n_in=128,
    # and a ragged last M tile is handled by Pallas (garbage rows are discarded).
    M = B * A
    rep = representation.reshape(M, n_in).astype(jnp.bfloat16)
    if n_in_p != n_in:
        rep = jnp.pad(rep, ((0, 0), (0, n_in_p - n_in)))

    TM = None
    for cand in (2048, 1024, 512, 256, 128):
        if M >= cand:
            TM = cand
            break
    if TM is None:
        TM = _round_up(max(M, 16), 16)     # bf16 sublane packing wants multiples of 16
    if M < TM:                             # tiny-M case only: cheap row pad
        rep = jnp.pad(rep, ((0, TM - M), (0, 0)))
    Mp = rep.shape[0]

    out = pl.pallas_call(
        mlp_kernel,
        out_shape=jax.ShapeDtypeStruct((Mp, n_out_p), jnp.float32),
        grid_spec=pltpu.PrefetchScalarGridSpec(
            num_scalar_prefetch=0,
            grid=(pl.cdiv(Mp, TM),),
            in_specs=[
                pl.BlockSpec((TM, n_in_p), lambda i: (i, 0)),      # representation tile
                pl.BlockSpec((n_in_p, Hp), lambda i: (0, 0)),      # W1 (resident, bf16)
                pl.BlockSpec((1, Hp), lambda i: (0, 0)),           # b1
                pl.BlockSpec((Hp, n_out_p), lambda i: (0, 0)),     # W2 (resident)
                pl.BlockSpec((1, n_out_p), lambda i: (0, 0)),      # b2
            ],
            out_specs=pl.BlockSpec((TM, n_out_p), lambda i: (i, 0)),
        ),
        compiler_params=pltpu.CompilerParams(
            dimension_semantics=("parallel",)),
    )(rep, w1, b1, w2, b2)

    return out[:M, :n_out].reshape(B, A, n_out)


# ----------------------------------------------------------------------------
# Kernel 2: batched-molecule geometry -> symmetrized 3x3 global polarizability.
# ----------------------------------------------------------------------------
def polar_geom_kernel(dv_ref, nc_ref, nmask_ref, amask_ref, out_ref):
    # dv_ref:    (TB, 3, Ap, Np)  distance-vector component planes
    # nc_ref:    (TB, 2, Ap, Np)  gathered neighbor contributions (chan 0 / 1)
    # nmask_ref: (TB, Ap, Np)     neighbor mask (padding folded in as zeros)
    # amask_ref: (TB, Ap, 1)      atom mask
    # out_ref:   (TB, 3, 3)       symmetrized global polarizability
    dv = dv_ref[...]
    nc = nc_ref[...]
    nmask = nmask_ref[...]
    amask = amask_ref[...]

    dvx, dvy, dvz = dv[:, 0], dv[:, 1], dv[:, 2]                   # (TB, Ap, Np)
    nc1, nc2 = nc[:, 0], nc[:, 1]

    dist2 = dvx * dvx + dvy * dvy + dvz * dvz
    dist3 = dist2 * jnp.sqrt(dist2)                                # distances ** 3

    # Atomic dipoles: masked lane (neighbor) reductions.
    wd = nc1 * nmask
    dx = jnp.sum(dvx * wd, axis=2, keepdims=True)                  # (TB, Ap, 1)
    dy = jnp.sum(dvy * wd, axis=2, keepdims=True)
    dz = jnp.sum(dvz * wd, axis=2, keepdims=True)

    # Atomic fields: divide replaced by EUP reciprocal (exact, off the VALU).
    masked_dist = dist3 * nmask + (1.0 - nmask)
    inv_md = pl.reciprocal(masked_dist, approx=False)
    wf = nc2 * nmask * inv_md
    fx = jnp.sum(dvx * wf, axis=2, keepdims=True)                  # (TB, Ap, 1)
    fy = jnp.sum(dvy * wf, axis=2, keepdims=True)
    fz = jnp.sum(dvz * wf, axis=2, keepdims=True)

    fnorm = jnp.sqrt(fx * fx + fy * fy + fz * fz)
    fnorm = fnorm + (fnorm < 1e-10).astype(jnp.float32)
    inv_norm = pl.reciprocal(fnorm, approx=False)
    fx = fx * inv_norm
    fy = fy * inv_norm
    fz = fz * inv_norm

    # Fold atom mask into the dipoles.
    dxm = dx * amask
    dym = dy * amask
    dzm = dz * amask

    # Width-3 component rows built with iota/select (no concatenate/transpose).
    tb, ap = dxm.shape[0], dxm.shape[1]
    lane = jax.lax.broadcasted_iota(jnp.int32, (tb, ap, 3), 2)
    f3 = jnp.where(lane == 0, fx, jnp.where(lane == 1, fy, fz))    # (TB, Ap, 3)
    d3 = jnp.where(lane == 0, dxm, jnp.where(lane == 1, dym, dzm))

    # G[i, j] = sum_a m_a d_i f_j ; rows of G and of G^T via sublane reductions.
    g0 = jnp.sum(dxm * f3, axis=1, keepdims=True)                  # (TB, 1, 3)
    g1 = jnp.sum(dym * f3, axis=1, keepdims=True)
    g2 = jnp.sum(dzm * f3, axis=1, keepdims=True)
    t0 = jnp.sum(fx * d3, axis=1, keepdims=True)                   # rows of G^T
    t1 = jnp.sum(fy * d3, axis=1, keepdims=True)
    t2 = jnp.sum(fz * d3, axis=1, keepdims=True)

    r0 = 0.5 * (g0 + t0)
    r1 = 0.5 * (g1 + t1)
    r2 = 0.5 * (g2 + t2)

    sub = jax.lax.broadcasted_iota(jnp.int32, (tb, 3, 3), 1)
    sym = jnp.where(sub == 0, r0, jnp.where(sub == 1, r1, r2))     # (TB, 3, 3)
    out_ref[...] = sym


def polarizability(representation, positions, neighbors, nbh_mask, atom_mask, params):
    """Full Polarizability forward. Returns {'y': global_polar (B, 3, 3)}."""
    B, A, _ = positions.shape
    N = neighbors.shape[-1]

    contributions = out_net(representation, params)                       # (B, A, 2)

    # Atom axis padded to a multiple of 8 (sublanes).  Neighbor (lane) axis is
    # padded to a multiple of 128 only when that inflates HBM bytes < 2x
    # (N >= 64); for small N the full-dim layout is legal and cheaper.
    Ap = _round_up(A, 8)
    Np = _round_up(N, 128) if (N % 128 == 0 or N >= 64) else N

    # Transpose the SMALL source arrays before the gather so the big gathered
    # arrays come out directly in the lane-friendly (B, comp, A, N) layout.
    pos_t = jnp.transpose(positions.astype(jnp.float32), (0, 2, 1))       # (B, 3, A)
    con_t = jnp.transpose(contributions, (0, 2, 1))                       # (B, 2, A)
    if Ap != A:
        pos_t = jnp.pad(pos_t, ((0, 0), (0, 0), (0, Ap - A)))
        con_t = jnp.pad(con_t, ((0, 0), (0, 0), (0, Ap - A)))

    nbr = neighbors.astype(jnp.int32)
    nmask = nbh_mask.astype(jnp.float32)
    if Ap != A or Np != N:
        nbr = jnp.pad(nbr, ((0, 0), (0, Ap - A), (0, Np - N)))            # pad idx -> 0
        nmask = jnp.pad(nmask, ((0, 0), (0, Ap - A), (0, Np - N)))        # pad mask -> 0
    amask = atom_mask.astype(jnp.float32)
    if Ap != A:
        amask = jnp.pad(amask, ((0, 0), (0, Ap - A)))
    amask = amask.reshape(B, Ap, 1)

    # Data-dependent neighbor gathers (XLA), writing the kernel layout once.
    idx = nbr.reshape(B, 1, Ap * Np)
    nbr_pos = jnp.take_along_axis(
        pos_t, jnp.broadcast_to(idx, (B, 3, Ap * Np)), axis=2).reshape(B, 3, Ap, Np)
    dv_t = nbr_pos - pos_t[:, :, :, None]                                 # (B, 3, Ap, Np)
    nc_t = jnp.take_along_axis(
        con_t, jnp.broadcast_to(idx, (B, 2, Ap * Np)), axis=2).reshape(B, 2, Ap, Np)

    # Batch molecules per grid step: ~1 MiB per step, but keep >= 2 grid steps
    # when possible so v7x's two TensorCores both get work.
    per_mol_bytes = (3 + 2 + 1) * Ap * Np * 4 + Ap * 4
    TB = max(1, min(B, (1 << 20) // max(per_mol_bytes, 1)))
    if B >= 2:
        TB = min(TB, max(1, B // 2))
    while B % TB != 0:
        TB -= 1

    global_polar = pl.pallas_call(
        polar_geom_kernel,
        out_shape=jax.ShapeDtypeStruct((B, 3, 3), jnp.float32),
        grid_spec=pltpu.PrefetchScalarGridSpec(
            num_scalar_prefetch=0,
            grid=(B // TB,),
            in_specs=[
                pl.BlockSpec((TB, 3, Ap, Np), lambda b: (b, 0, 0, 0)),
                pl.BlockSpec((TB, 2, Ap, Np), lambda b: (b, 0, 0, 0)),
                pl.BlockSpec((TB, Ap, Np), lambda b: (b, 0, 0)),
                pl.BlockSpec((TB, Ap, 1), lambda b: (b, 0, 0)),
            ],
            out_specs=pl.BlockSpec((TB, 3, 3), lambda b: (b, 0, 0)),
        ),
        compiler_params=pltpu.CompilerParams(
            dimension_semantics=("parallel",)),
    )(dv_t, nc_t, nmask, amask)

    return {"y": global_polar}


# ----------------------------------------------------------------------------
# Pure-JAX reference (mirrors the torch module line by line).
# ----------------------------------------------------------------------------
def _reference(representation, positions, neighbors, nbh_mask, atom_mask, params,
               first_layer_dtype=jnp.float32):
    rep = representation.astype(first_layer_dtype)
    w1 = params["w1"].astype(first_layer_dtype)
    h = jnp.dot(rep, w1, preferred_element_type=jnp.float32) + params["b1"]
    h = jnp.maximum(h, 0.0) + jnp.log(1.0 + jnp.exp(-jnp.abs(h))) - LOG2
    contributions = h @ params["w2"] + params["b2"]                       # (B, A, 2)

    B = positions.shape[0]
    bidx = jnp.arange(B)[:, None, None]
    nbr_pos = positions[bidx, neighbors]
    dist_vec = nbr_pos - positions[:, :, None, :]
    distances = jnp.sqrt(jnp.sum(dist_vec ** 2, axis=-1))
    nbr_contrib = contributions[bidx, neighbors]
    nc1 = nbr_contrib[..., 0]
    nc2 = nbr_contrib[..., 1]

    atomic_dipoles = jnp.sum(dist_vec * nc1[..., None] * nbh_mask[..., None], axis=2)
    masked_dist = distances ** 3 * nbh_mask + (1.0 - nbh_mask)
    nbh_fields = dist_vec * nc2[..., None] / masked_dist[..., None]
    atomic_fields = jnp.sum(nbh_fields * nbh_mask[..., None], axis=2)
    field_norm = jnp.sqrt(jnp.sum(atomic_fields ** 2, axis=-1, keepdims=True))
    field_norm = field_norm + (field_norm < 1e-10).astype(jnp.float32)
    atomic_fields = atomic_fields / field_norm

    atomic_polar = atomic_dipoles[..., None] * atomic_fields[:, :, None, :]
    atomic_polar = 0.5 * (atomic_polar + jnp.swapaxes(atomic_polar, -1, -2))
    global_polar = jnp.sum(atomic_polar * atom_mask[:, :, None, None], axis=1)
    return global_polar


if __name__ == "__main__":
    # Small deterministic example: batch=2, atoms=8, neighbors=6, n_in=128 (module default).
    B, A, N, n_in = 2, 8, 6, 128
    H = n_in // 2          # pyramidal hidden width
    n_out = 2              # Polarizability's out_net predicts 2 channels per atom

    key = jax.random.PRNGKey(0)
    k_rep, k_pos, k_w1, k_b1, k_w2, k_b2, k_nm = jax.random.split(key, 7)

    representation = jax.random.normal(k_rep, (B, A, n_in), dtype=jnp.float32)

    # Atoms near cube corners (well-separated distances) with a little jitter.
    corners = jnp.array(
        [[i, j, k] for i in (0.0, 2.0) for j in (0.0, 2.0) for k in (0.0, 2.0)],
        dtype=jnp.float32)                                            # (8, 3)
    positions = corners[None] + 0.1 * jax.random.normal(k_pos, (B, A, 3), dtype=jnp.float32)

    # neighbors[b, a, k] = (a + k + 1) mod A  (never the atom itself).
    neighbors = (jnp.arange(A)[:, None] + jnp.arange(1, N + 1)[None, :]) % A
    neighbors = jnp.tile(neighbors[None], (B, 1, 1)).astype(jnp.int32)

    nbh_mask = (jax.random.uniform(k_nm, (B, A, N)) > 0.2).astype(jnp.float32)
    atom_mask = jnp.ones((B, A), dtype=jnp.float32).at[1, A - 2:].set(0.0)

    params = {
        "w1": jax.random.normal(k_w1, (n_in, H), dtype=jnp.float32) / math.sqrt(n_in),
        "b1": jax.random.normal(k_b1, (H,), dtype=jnp.float32) * 0.1,
        "w2": jax.random.normal(k_w2, (H, n_out), dtype=jnp.float32) / math.sqrt(H),
        "b2": jax.random.normal(k_b2, (n_out,), dtype=jnp.float32) * 0.1,
    }

    result = polarizability(representation, positions, neighbors, nbh_mask, atom_mask, params)
    y = result["y"]
    jax.block_until_ready(y)
    assert y.shape == (B, 3, 3)

    # Tight check vs a reference using the same bf16 first-layer quantization.
    y_ref_q = _reference(representation, positions, neighbors, nbh_mask, atom_mask,
                         params, first_layer_dtype=jnp.bfloat16)
    err_q = float(jnp.max(jnp.abs(y - y_ref_q)))
    assert jnp.allclose(y, y_ref_q, atol=2e-3, rtol=2e-3), err_q

    # Loose sanity check vs the exact f32 torch-equivalent reference
    # (bf16 matmul operands introduce ~1e-3 relative deviation).
    y_ref = _reference(representation, positions, neighbors, nbh_mask, atom_mask,
                       params, first_layer_dtype=jnp.float32)
    rel = float(jnp.linalg.norm(y - y_ref) / (jnp.linalg.norm(y_ref) + 1e-12))
    assert rel < 5e-2, rel

    print("KERNEL_OK")
</pallas_src>

<mosaic_0001>
module attributes {stable_mosaic.version = 11 : i64} {
  func.func @mlp_kernel(%arg0: i32, %arg1: memref<16x128xbf16, #tpu.memory_space<vmem>>, %arg2: memref<128x128xbf16, #tpu.memory_space<vmem>>, %arg3: memref<1x128xf32, #tpu.memory_space<vmem>>, %arg4: memref<128x128xf32, #tpu.memory_space<vmem>>, %arg5: memref<1x128xf32, #tpu.memory_space<vmem>>, %arg6: memref<16x128xf32, #tpu.memory_space<vmem>>) attributes {dimension_semantics = [#tpu.dimension_semantics<parallel>], iteration_bounds = array<i64: 1>, scalar_prefetch = 0 : i64, scratch_operands = 0 : i64, tpu.core_type = #tpu.core_type<tc>, window_params = [{transform_indices = @transform_0, window_bounds = array<i64: 16, 128>}, {pipeline_mode = #tpu.pipeline_mode<synchronous>, transform_indices = @transform_1, window_bounds = array<i64: 128, 128>}, {pipeline_mode = #tpu.pipeline_mode<synchronous>, transform_indices = @transform_2, window_bounds = array<i64: 1, 128>}, {pipeline_mode = #tpu.pipeline_mode<synchronous>, transform_indices = @transform_3, window_bounds = array<i64: 128, 128>}, {pipeline_mode = #tpu.pipeline_mode<synchronous>, transform_indices = @transform_4, window_bounds = array<i64: 1, 128>}, {transform_indices = @transform_5, window_bounds = array<i64: 16, 128>}]} {
    %c0 = arith.constant 0 : index
    %c0_0 = arith.constant 0 : index
    %0 = vector.load %arg1[%c0, %c0_0] : memref<16x128xbf16, #tpu.memory_space<vmem>>, vector<16x128xbf16>
    %c0_1 = arith.constant 0 : index
    %c0_2 = arith.constant 0 : index
    %1 = vector.load %arg2[%c0_1, %c0_2] : memref<128x128xbf16, #tpu.memory_space<vmem>>, vector<128x128xbf16>
    %cst = arith.constant dense<0.000000e+00> : vector<16x128xf32>
    %2 = tpu.matmul %0, %1, %cst {dimension_numbers = #tpu.dot_dimension_numbers<[1], [0], [0], [1], [0, 0, 1, 1], [], []>} : vector<16x128xbf16>, vector<128x128xbf16>, vector<16x128xf32> -> vector<16x128xf32>
    %c0_3 = arith.constant 0 : index
    %c0_4 = arith.constant 0 : index
    %3 = vector.load %arg3[%c0_3, %c0_4] : memref<1x128xf32, #tpu.memory_space<vmem>>, vector<1x128xf32>
    %4 = vector.broadcast %3 : vector<1x128xf32> to vector<16x128xf32>
    %5 = arith.addf %2, %4 : vector<16x128xf32>
    %cst_5 = arith.constant 0.000000e+00 : f32
    %6 = vector.broadcast %cst_5 : f32 to vector<16x128xf32>
    %7 = arith.maximumf %5, %6 : vector<16x128xf32>
    %8 = math.absf %5 : vector<16x128xf32>
    %cst_6 = arith.constant 0.000000e+00 : f32
    %9 = vector.broadcast %cst_6 : f32 to vector<16x128xf32>
    %10 = arith.subf %9, %8 : vector<16x128xf32>
    %11 = math.exp %10 : vector<16x128xf32>
    %cst_7 = arith.constant 1.000000e+00 : f32
    %12 = vector.broadcast %cst_7 : f32 to vector<16x128xf32>
    %13 = arith.addf %12, %11 : vector<16x128xf32>
    %14 = math.log %13 : vector<16x128xf32>
    %15 = arith.addf %7, %14 : vector<16x128xf32>
    %cst_8 = arith.constant 0.693147182 : f32
    %16 = vector.broadcast %cst_8 : f32 to vector<16x128xf32>
    %17 = arith.subf %15, %16 : vector<16x128xf32>
    %c0_9 = arith.constant 0 : index
    %c0_10 = arith.constant 0 : index
    %18 = vector.load %arg4[%c0_9, %c0_10] : memref<128x128xf32, #tpu.memory_space<vmem>>, vector<128x128xf32>
    %cst_11 = arith.constant dense<0.000000e+00> : vector<16x128xf32>
    %19 = tpu.matmul %17, %18, %cst_11 {dimension_numbers = #tpu.dot_dimension_numbers<[1], [0], [0], [1], [0, 0, 1, 1], [], []>} : vector<16x128xf32>, vector<128x128xf32>, vector<16x128xf32> -> vector<16x128xf32>
    %c0_12 = arith.constant 0 : index
    %c0_13 = arith.constant 0 : index
    %20 = vector.load %arg5[%c0_12, %c0_13] : memref<1x128xf32, #tpu.memory_space<vmem>>, vector<1x128xf32>
    %21 = vector.broadcast %20 : vector<1x128xf32> to vector<16x128xf32>
    %22 = arith.addf %19, %21 : vector<16x128xf32>
    %c0_14 = arith.constant 0 : index
    %c0_15 = arith.constant 0 : index
    %23 = vector.load %arg6[%c0_14, %c0_15] : memref<16x128xf32, #tpu.memory_space<vmem>>, vector<16x128xf32>
    tpu.vector_store %arg6[%c0_14, %c0_15], %22 {strides = array<i32>} : memref<16x128xf32, #tpu.memory_space<vmem>>, vector<16x128xf32>,
    return
  }
  func.func @transform_0(%arg0: i32) -> (i32, i32) {
    %c0_i32 = arith.constant 0 : i32
    %c0_i32_0 = arith.constant 0 : i32
    return %arg0, %c0_i32 : i32, i32
  }
  func.func @transform_1(%arg0: i32) -> (i32, i32) {
    %c0_i32 = arith.constant 0 : i32
    %c0_i32_0 = arith.constant 0 : i32
    %c0_i32_1 = arith.constant 0 : i32
    return %c0_i32, %c0_i32_0 : i32, i32
  }
  func.func @transform_2(%arg0: i32) -> (i32, i32) {
    %c0_i32 = arith.constant 0 : i32
    %c0_i32_0 = arith.constant 0 : i32
    %c0_i32_1 = arith.constant 0 : i32
    return %c0_i32, %c0_i32_0 : i32, i32
  }
  func.func @transform_3(%arg0: i32) -> (i32, i32) {
    %c0_i32 = arith.constant 0 : i32
    %c0_i32_0 = arith.constant 0 : i32
    %c0_i32_1 = arith.constant 0 : i32
    return %c0_i32, %c0_i32_0 : i32, i32
  }
  func.func @transform_4(%arg0: i32) -> (i32, i32) {
    %c0_i32 = arith.constant 0 : i32
    %c0_i32_0 = arith.constant 0 : i32
    %c0_i32_1 = arith.constant 0 : i32
    return %c0_i32, %c0_i32_0 : i32, i32
  }
  func.func @transform_5(%arg0: i32) -> (i32, i32) {
    %c0_i32 = arith.constant 0 : i32
    %c0_i32_0 = arith.constant 0 : i32
    return %arg0, %c0_i32 : i32, i32
  }
}

</mosaic_0001>

<bundles_post_ra>
// kernel: tpu_custom_call.1
= control target key start
LH: loop header
LB: loop body
LE: loop exit
PB: predicated region body
PF: predicated region fallthrough
CT: control target
= control target key end

     0   :  { %10 = vsyncpa [#allocation3], 0  ;;  %s676_s0 = inlined_call_operand.hbm [shape: bf16[16,128], index: 0, kind: input, shape index: {}]   ;;  %s677_s1 = inlined_call_operand.hbm [shape: bf16[128,128], index: 1, kind: input, shape index: {}]   ;;  %s678_s2 = inlined_call_operand.vmem [shape: f32[1,128], index: 2, kind: input, shape index: {}]   ;;  %s679_s3 = inlined_call_operand.hbm [shape: f32[128,128], index: 3, kind: input, shape index: {}]   ;;  %s680_s4 = inlined_call_operand.vmem [shape: f32[1,128], index: 4, kind: input, shape index: {}]   ;;  %s681_s5 = inlined_call_operand.hbm [shape: f32[16,128], index: 5, kind: output, shape index: {}]  }
   0x1   :  { %11 = vsyncpa [#allocation6], 0 }
   0x2   :  { %12 = vsyncpa [#allocation4], 0  ;;  %s569_s18 = smov [#allocation5]   ;;  %s570_s20 = smov [#allocation2]  }
   0x3   :  { %s30_s19 = sshll.u32 %s569_s18, 4  ;;  %s18_s21 = sshll.u32 %s570_s20, 4  ;;  %s31_s19 = int_to_ptr.vmem [resolvable:$true] %s30_s19  ;;  %s609_s21 = int_to_ptr.vmem [resolvable:$true] %s18_s21 }
   0x4   :  { %s475_s24 = scalar_lea.hbm %s677_s1, 1024 }
   0x5   :  { %p476_p0 = scmp.ne.s32.totalorder %s677_s1, %s475_s24  ;;  %p479_p1 = scmp.lt.u32.totalorder %s475_s24, %s677_s1 }
   0x7   :  { %p481_p2 = pnand %p479_p1, %p476_p0 }
   0x9   :  { %484 = shalt.err (!%p481_p2)
}
   0xa   :  { %s485_s29 = scalar_lea.vmem %s31_s19, 1024  ;;  %p490_p4 = scmp.lt.s32.totalorder %s31_s19, %s31_s19 }
   0xb   :  { %p486_p3 = scmp.ne.s32.totalorder %s31_s19, %s485_s29  ;;  %p491_p5 = scmp.lt.s32.totalorder %s485_s29, %s485_s29 }
   0xd   :  { %p492_p6 = por %p491_p5, %p490_p4 }
   0xf   :  { %p493_p7 = pnand %p492_p6, %p486_p3 }
  0x11   :  { %496 = shalt.err (!%p493_p7)
}
  0x12   :  { %s571_s30 = smov 64   ;;  %s572_s6 = smov 4  }
  0x13   :  { %36 = dma.hbm_to_vmem [thread:$0]  %s677_s1, 1024, %s31_s19, [#allocation6], %s571_s30, %s571_s30, %s572_s6  }
  0x14   :  { %s497_s11 = scalar_lea.hbm %s676_s0, 128 }
  0x15   :  { %p498_p8 = scmp.ne.s32.totalorder %s676_s0, %s497_s11  ;;  %p501_p9 = scmp.lt.u32.totalorder %s497_s11, %s676_s0 }
  0x17   :  { %p503_p10 = pnand %p501_p9, %p498_p8 }
  0x19   :  { %506 = shalt.err (!%p503_p10)
}
  0x1a   :  { %s507_s16 = scalar_lea.vmem %s609_s21, 128  ;;  %p512_p12 = scmp.lt.s32.totalorder %s609_s21, %s609_s21 }
  0x1b   :  { %p508_p11 = scmp.ne.s32.totalorder %s609_s21, %s507_s16  ;;  %p513_p13 = scmp.lt.s32.totalorder %s507_s16, %s507_s16 }
  0x1d   :  { %p514_p0 = por %p513_p13, %p512_p12 }
  0x1f   :  { %p515_p1 = pnand %p514_p0, %p508_p11 }
  0x21   :  { %518 = shalt.err (!%p515_p1)
}
  0x22   :  { %24 = dma.hbm_to_vmem [thread:$0]  %s676_s0, 128, %s609_s21, [#allocation3], %s571_s30, %s571_s30, %s572_s6  }
  0x23   :  { %s573_s18 = smov [#allocation7]   ;;  %s519_s23 = scalar_lea.hbm %s679_s3, 2048 }
  0x24   :  { %s44_s19 = sshll.u32 %s573_s18, 4  ;;  %p520_p2 = scmp.ne.s32.totalorder %s679_s3, %s519_s23  ;;  %s45_s19 = int_to_ptr.vmem [resolvable:$true] %s44_s19 }
  0x25   :  { %p523_p3 = scmp.lt.u32.totalorder %s519_s23, %s679_s3 }
  0x27   :  { %p525_p4 = pnand %p523_p3, %p520_p2 }
  0x29   :  { %528 = shalt.err (!%p525_p4)
}
  0x2a   :  { %s529_s28 = scalar_lea.vmem %s45_s19, 2048  ;;  %p534_p6 = scmp.lt.s32.totalorder %s45_s19, %s45_s19 }
  0x2b   :  { %p530_p5 = scmp.ne.s32.totalorder %s45_s19, %s529_s28  ;;  %p535_p7 = scmp.lt.s32.totalorder %s529_s28, %s529_s28 }
  0x2d   :  { %p536_p8 = por %p535_p7, %p534_p6 }
  0x2f   :  { %p537_p9 = pnand %p536_p8, %p530_p5 }
  0x31   :  { %540 = shalt.err (!%p537_p9)
}
  0x32   :  { %s574_s0 = smov 128   ;;  %s575_s21 = smov 8  }
  0x33   :  { %50 = dma.hbm_to_vmem [thread:$0]  %s679_s3, 2048, %s45_s19, [#allocation6], %s574_s0, %s574_s0, %s575_s21  }
  0x34   :  { %563 = dma.done.wait [#allocation3], 128  }
  0x35   :  { %564 = vsyncadd [#allocation3], 4294967168 }
  0x36   :  { %565 = dma.done.wait [#allocation6], 3072  }
  0x37   :  { %566 = vsyncadd [#allocation6], 4294964224  ;;  %v576_v0 = vmov 0.0   ;;  %vm577_vm0 = vmmov 0   ;;  %v458_v1 = vld [vmem:[#allocation5] sm:$0xff]   ;;  %v459_v2 = vld [vmem:[#allocation5 + $0x8] sm:$0xff]  }
  0x38   :  { %361 = vmatprep.subr.bf16.mxu0 %v576_v0  ;;  %377 = vmatprep.mubr.msk.bf16.mxu0 %vm577_vm0, %v576_v0  ;;  %v460_v3 = vld [vmem:[#allocation5 + $0x10] sm:$0xff]   ;;  %v461_v4 = vld [vmem:[#allocation5 + $0x18] sm:$0xff]   ;;  %v462_v5 = vld [vmem:[#allocation5 + $0x20] sm:$0xff]   ;;  %s578_s8 = smov [#allocation8]  }
  0x39   :  { %362 = vmatpush3.bf16.msra.mxu0 %v458_v1  ;;  %v463_v6 = vld [vmem:[#allocation5 + $0x28] sm:$0xff]   ;;  %v464_v7 = vld [vmem:[#allocation5 + $0x30] sm:$0xff]   ;;  %v465_v8 = vld [vmem:[#allocation5 + $0x38] sm:$0xff]   ;;  %s308_s9 = sshll.u32 %s578_s8, 4  ;;  %s309_s9 = int_to_ptr.vmem [resolvable:$true] %s308_s9 }
  0x3a   :  { %363 = vmatprep.subr.bf16.mxu0 %v576_v0  ;;  %v466_v9 = vld [vmem:[#allocation2] sm:$0xff]   ;;  %v203_v10 = vld [vmem:[#allocation7] sm:$0xff]  ;;  %v204_v11 = vld [vmem:[#allocation7 + $0x8] sm:$0xff]  ;;  %s541_s10 = scalar_lea.vmem %s309_s9, 256  ;;  %p546_p11 = scmp.lt.s32.totalorder %s309_s9, %s309_s9 }
  0x3b   :  { %v416_v12 = vpack.c.bf16 %v204_v11, %v203_v10  ;;  %v205_v13 = vld [vmem:[#allocation7 + $0x10] sm:$0xff]  ;;  %v206_v14 = vld [vmem:[#allocation7 + $0x18] sm:$0xff]  ;;  %v207_v16 = vld [vmem:[#allocation7 + $0x20] sm:$0xff]  ;;  %p542_p10 = scmp.ne.s32.totalorder %s309_s9, %s541_s10  ;;  %p547_p12 = scmp.lt.s32.totalorder %s541_s10, %s541_s10 }
  0x3c   :  { %v420_v15 = vpack.c.bf16 %v206_v14, %v205_v13  ;;  %v208_v17 = vld [vmem:[#allocation7 + $0x28] sm:$0xff]  ;;  %v209_v19 = vld [vmem:[#allocation7 + $0x30] sm:$0xff]  ;;  %v210_v20 = vld [vmem:[#allocation7 + $0x38] sm:$0xff] }
  0x3d   :  { %364 = vmatpush3.bf16.msra.mxu0 %v459_v2  ;;  %417 = vmatprep.subr.bf16.mxu1 %v416_v12  ;;  %v424_v18 = vpack.c.bf16 %v208_v17, %v207_v16  ;;  %v428_v21 = vpack.c.bf16 %v210_v20, %v209_v19  ;;  %v211_v22 = vld [vmem:[#allocation7 + $0x40] sm:$0xff]  ;;  %v212_v23 = vld [vmem:[#allocation7 + $0x48] sm:$0xff]  ;;  %v213_v25 = vld [vmem:[#allocation7 + $0x50] sm:$0xff]  ;;  %p548_p13 = por %p547_p12, %p546_p11 }
  0x3e   :  { %365 = vmatprep.subr.bf16.mxu0 %v576_v0  ;;  %419 = vmatpush3.bf16.msra.mxu1 %v416_v12  ;;  %v432_v24 = vpack.c.bf16 %v212_v23, %v211_v22  ;;  %v214_v26 = vld [vmem:[#allocation7 + $0x58] sm:$0xff]  ;;  %v215_v27 = vld [vmem:[#allocation7 + $0x60] sm:$0xff]  ;;  %v216_v29 = vld [vmem:[#allocation7 + $0x68] sm:$0xff] }
  0x3f   :  { %421 = vmatprep.subr.bf16.mxu1 %v420_v15  ;;  %v436_v28 = vpack.c.bf16 %v214_v26, %v213_v25  ;;  %v440_v30 = vpack.c.bf16 %v216_v29, %v215_v27  ;;  %v217_v31 = vld [vmem:[#allocation7 + $0x70] sm:$0xff]  ;;  %v218_v32 = vld [vmem:[#allocation7 + $0x78] sm:$0xff]  ;;  %p549_p0 = pnand %p548_p13, %p542_p10 }
  0x40   :  { %v444_v33 = vpack.c.bf16 %v218_v32, %v217_v31  ;;  %v321_v34 = vld [vmem:[%s678_s2] ss:$0 sm:$0xff] }
  0x41   :  { %366 = vmatpush3.bf16.msra.mxu0 %v460_v3  ;;  %v333_v61 = vld [vmem:[%s680_s4] ss:$0 sm:$0xff] }
  0x42   :  { %367 = vmatprep.subr.bf16.mxu0 %v576_v0  ;;  %423 = vmatpush3.bf16.msra.mxu1 %v420_v15 }
  0x43   :  { %425 = vmatprep.subr.bf16.mxu1 %v424_v18 }
  0x45   :  { %368 = vmatpush3.bf16.msra.mxu0 %v461_v4 }
  0x46   :  { %369 = vmatprep.subr.bf16.mxu0 %v576_v0  ;;  %427 = vmatpush3.bf16.msra.mxu1 %v424_v18 }
  0x47   :  { %429 = vmatprep.subr.bf16.mxu1 %v428_v21 }
  0x49   :  { %370 = vmatpush3.bf16.msra.mxu0 %v462_v5 }
  0x4a   :  { %371 = vmatprep.subr.bf16.mxu0 %v576_v0  ;;  %431 = vmatpush3.bf16.msra.mxu1 %v428_v21 }
  0x4b   :  { %433 = vmatprep.subr.bf16.mxu1 %v432_v24 }
  0x4d   :  { %372 = vmatpush3.bf16.msra.mxu0 %v463_v6 }
  0x4e   :  { %373 = vmatprep.subr.bf16.mxu0 %v576_v0  ;;  %435 = vmatpush3.bf16.msra.mxu1 %v432_v24 }
  0x4f   :  { %437 = vmatprep.subr.bf16.mxu1 %v436_v28 }
  0x51   :  { %374 = vmatpush3.bf16.msra.mxu0 %v464_v7 }
  0x52   :  { %375 = vmatprep.subr.bf16.mxu0 %v576_v0  ;;  %439 = vmatpush3.bf16.msra.mxu1 %v436_v28 }
  0x53   :  { %441 = vmatprep.subr.bf16.mxu1 %v440_v30 }
  0x55   :  { %376 = vmatpush3.bf16.msra.mxu0 %v465_v8 }
  0x56   :  { %443 = vmatpush3.bf16.msra.mxu1 %v440_v30 }
  0x57   :  { %445 = vmatprep.subr.bf16.mxu1 %v444_v33 }
  0x58   :  { %378 = vmatmul.mubr.bf16.vlgmr.msra.gmra.mrb[0].mxu0 %v466_v9 }
  0x5a   :  { %447 = vmatpush3.bf16.msra.mxu1 %v444_v33 }
 0x12b   :  { %v176_v35 = vpop.f32.mrb[0].mxu0 }
 0x12c   :  { %v177_v36 = vadd.f32 %v321_v34, %v176_v35  ;;  %v379_v37 = vpop.f32.mrb[1].mxu0 }
 0x12d   :  { %v179_v38 = vpop.f32.mrb[2].mxu0 }
 0x12e   :  { %v185_v39 = vand.u32 2147483647, %v177_v36  ;;  %v180_v40 = vadd.f32 %v321_v34, %v179_v38  ;;  %v380_v41 = vpop.f32.mrb[3].mxu0  ;;  %v183_v52 = vmax.f32 %v177_v36, 0.0 }
 0x130   :  { %v187_v42 = vsub.f32 0.0, %v185_v39  ;;  %v186_v43 = vand.u32 2147483647, %v180_v40  ;;  %v184_v55 = vmax.f32 %v180_v40, 0.0 }
 0x132   :  { %v189_v44 = vmul.f32 1.442695, %v187_v42  ;;  %v188_v45 = vsub.f32 0.0, %v186_v43 }
 0x134   :  { %467 = vpow2.f32 %v189_v44  ;;  %v191_v46 = vmul.f32 1.442695, %v188_v45 }
 0x136   :  { %469 = vpow2.f32 %v191_v46 }
 0x13e   :  { %v468_v47 = vpop.eup %467 }
 0x13f   :  { %v193_v48 = vadd.f32 1.0, %v468_v47 }
 0x140   :  { %v470_v49 = vpop.eup %469 }
 0x141   :  { %v194_v50 = vadd.f32 1.0, %v470_v49  ;;  %471 = vlog2.f32 %v193_v48 }
 0x143   :  { %473 = vlog2.f32 %v194_v50 }
 0x14b   :  { %v472_v51 = vpop.eup %471 }
 0x14c   :  { %v196_v53 = vmul.f32 0.6931472, %v472_v51 }
 0x14d   :  { %v474_v54 = vpop.eup %473 }
 0x14e   :  { %v199_v56 = vadd.f32 %v196_v53, %v183_v52  ;;  %v198_v57 = vmul.f32 0.6931472, %v474_v54 }
 0x150   :  { %v331_v58 = vadd.f32 -0.6931472, %v199_v56  ;;  %v200_v59 = vadd.f32 %v198_v57, %v184_v55 }
 0x152   :  { %413 = vmatprep.mubr.f32.mxu1 %v331_v58  ;;  %v332_v60 = vadd.f32 -0.6931472, %v200_v59 }
 0x154   :  { %414 = vmatmul.mubr.f32.vlgmr.msra.gmra.mrb[0].mxu1 %v332_v60 }
 0x227   :  { %v415_v62 = vpop.f32.mrb[0].mxu1 }
 0x228   :  { %v298_v63 = vadd.f32 %v415_v62, %v333_v61  ;;  %v292_v0 = vpop.f32.mrb[1].mxu1 }
 0x229   :  { %v293_v1 = vadd.f32 %v333_v61, %v292_v0 }
 0x22a   :  { %302 = vst [vmem:[#allocation8 + $0x8] sm:$0xff] %v298_v63 }
 0x22b   :  { %301 = vst [vmem:[#allocation8] sm:$0xff] %v293_v1 }
 0x22c   :  { %552 = shalt.err (!%p549_p0)
}
 0x22d   :  { %s553_s4 = scalar_lea.hbm %s681_s5, 256 }
 0x22e   :  { %p554_p1 = scmp.ne.s32.totalorder %s681_s5, %s553_s4  ;;  %p557_p2 = scmp.lt.u32.totalorder %s553_s4, %s681_s5 }
 0x230   :  { %p559_p3 = pnand %p557_p2, %p554_p1 }
 0x232   :  { %562 = shalt.err (!%p559_p3)
}
 0x233   :  { %314 = dma.vmem_to_hbm [thread:$0]  %s309_s9, 256, %s681_s5, [#allocation4], %s574_s0, %s574_s0, %s575_s21  }
 0x234   :  { %567 = dma.done.wait [#allocation4], 256  }
 0x235   :  { %568 = vsyncadd [#allocation4], 4294967040 }
 0x236   :  { %318 = vsyncpa [#allocation3], 1 }
 0x237   :  { %319 = vsyncpa [#allocation6], 1 }
 0x238   :  { %320 = vsyncpa [#allocation4], 1 }

</bundles_post_ra>
